<compile_context>
chip_gen: v5e
topology: v5e:2x2
jax: 0.10.0
libtpu: 0.0.40
codegen_flags: <defaults>
</compile_context>

<pallas_src>
import functools
import math

import jax
import jax.numpy as jnp
from jax.experimental import pallas as pl
from jax.experimental.pallas import tpu as pltpu


_DILATIONS = (1, 3, 9)
_PAD = 56        # >= 6 * max(dilation) = 54; multiple of 8 so the main scratch
                 # copy lands on a sublane boundary.
_PAD0 = 8        # halo for the first k=7, dilation=1 conv (>= 6, multiple of 8)

_CPARAMS = pltpu.CompilerParams(dimension_semantics=("parallel",))


def _elu(x):
    # ELU(alpha=1): x if x > 0 else exp(x) - 1   (computed in f32)
    return jnp.where(x > 0, x, jnp.expm1(jnp.minimum(x, 0.0)))


# ----------------------------------------------------------------------------
# Kernel 1: first CausalConv1d (D -> 16C, k=7), zero halo built in VMEM scratch
# ----------------------------------------------------------------------------
def _conv_in_kernel(x_ref, w_ref, b_ref, o_ref, xpad):
    # x_ref: (1, L, Cin) bf16   w_ref: (7, Cin, Cout) bf16   b_ref: (1, Cout) f32
    # o_ref: (1, L, Cout) bf16  xpad: (_PAD0 + L, Cin) bf16 scratch
    L = x_ref.shape[1]
    Cin = x_ref.shape[2]
    Cout = o_ref.shape[2]
    xpad[pl.ds(0, _PAD0), :] = jnp.zeros((_PAD0, Cin), xpad.dtype)
    xpad[pl.ds(_PAD0, L), :] = x_ref[0]
    acc = jnp.zeros((L, Cout), jnp.float32) + b_ref[...]
    base = _PAD0 - 6
    for k in range(7):  # static unrolled tap loop
        acc = acc + jnp.dot(xpad[pl.ds(base + k, L), :], w_ref[k],
                            preferred_element_type=jnp.float32)
    o_ref[0] = acc.astype(o_ref.dtype)


# ----------------------------------------------------------------------------
# Kernel 2: causal ConvTranspose1d (k=2s, stride=s), lane-dense output slab
#   out[t*s + r, c] = x[t] @ W[r, :, c] + x[t-1] @ W[r+s, :, c] + b[c]
#   emitted as h[t, r*Cout + c]; the wrapper's row-major reshape de-interleaves.
# ----------------------------------------------------------------------------
def _convT_kernel(x_ref, wc_ref, wp_ref, b_ref, o_ref, xprev):
    # x_ref : (1, Lin, Cin) bf16
    # wc_ref: (Cin, s*Cout) bf16  (col r*Cout+c = W[r, :, c])
    # wp_ref: (Cin, s*Cout) bf16  (col r*Cout+c = W[r+s, :, c])
    # b_ref : (1, s*Cout) f32
    # o_ref : (1, Lin, s*Cout) bf16
    # xprev : (Lin, Cin) bf16 scratch  (x shifted down one row, row 0 = 0)
    Lin, Cin = x_ref.shape[1], x_ref.shape[2]
    xprev[pl.ds(0, 1), :] = jnp.zeros((1, Cin), xprev.dtype)
    xprev[pl.ds(1, Lin - 1), :] = x_ref[0, pl.ds(0, Lin - 1), :]
    h = (jnp.dot(x_ref[0], wc_ref[...], preferred_element_type=jnp.float32)
         + jnp.dot(xprev[...], wp_ref[...], preferred_element_type=jnp.float32)
         + b_ref[...])
    o_ref[0] = h.astype(o_ref.dtype)


# ----------------------------------------------------------------------------
# Kernel 3: fused stack of 3 ResidualUnits (dilations 1/3/9), activation kept
# in a VMEM scratch between units; optionally fuses the final Conv1d(C -> 1).
# ----------------------------------------------------------------------------
def _res_stack_impl(x_ref, w1_ref, b1_ref, w2_ref, b2_ref, o_ref, act,
                    wf_ref, bf_ref):
    # x_ref : (1, L, C) bf16
    # w1_ref: (21, C, C) bf16 (3 units x 7 taps)   b1_ref: (3, 1, C) f32
    # w2_ref: (3, C, C)  bf16                      b2_ref: (3, 1, C) f32
    # act   : (_PAD + L, C) bf16 scratch; rows [0, _PAD) stay zero (causal halo)
    # o_ref : (1, L, C) bf16, or (1, L, 1) f32 when the final conv is fused
    L, C = x_ref.shape[1], x_ref.shape[2]
    act[pl.ds(0, _PAD), :] = jnp.zeros((_PAD, C), act.dtype)
    act[pl.ds(_PAD, L), :] = x_ref[0]

    for j, d in enumerate(_DILATIONS):
        acc = jnp.zeros((L, C), jnp.float32) + b1_ref[j]
        base = _PAD - 6 * d
        for k in range(7):  # static unrolled tap loop
            acc = acc + jnp.dot(act[pl.ds(base + k * d, L), :],
                                w1_ref[j * 7 + k],
                                preferred_element_type=jnp.float32)
        h = _elu(acc)
        h = jnp.dot(h.astype(jnp.bfloat16), w2_ref[j],
                    preferred_element_type=jnp.float32) + b2_ref[j]
        res = act[pl.ds(_PAD, L), :].astype(jnp.float32) + _elu(h)
        act[pl.ds(_PAD, L), :] = res.astype(act.dtype)

    if wf_ref is None:
        o_ref[0] = act[pl.ds(_PAD, L), :].astype(o_ref.dtype)
    else:
        # fused final CausalConv1d(C -> 1, k=7); halo rows [_PAD-6, _PAD) are 0
        accf = jnp.zeros((L, 1), jnp.float32) + bf_ref[...]
        base = _PAD - 6
        for k in range(7):
            accf = accf + jnp.dot(act[pl.ds(base + k, L), :], wf_ref[k],
                                  preferred_element_type=jnp.float32)
        o_ref[0] = accf.astype(o_ref.dtype)


def _res_stack_kernel(x_ref, w1_ref, b1_ref, w2_ref, b2_ref, o_ref, act):
    _res_stack_impl(x_ref, w1_ref, b1_ref, w2_ref, b2_ref, o_ref, act,
                    None, None)


def _res_stack_final_kernel(x_ref, w1_ref, b1_ref, w2_ref, b2_ref,
                            wf_ref, bf_ref, o_ref, act):
    _res_stack_impl(x_ref, w1_ref, b1_ref, w2_ref, b2_ref, o_ref, act,
                    wf_ref, bf_ref)


# ----------------------------------------------------------------------------
# pallas_call wrappers
# ----------------------------------------------------------------------------
def conv_in(x, w, b):
    # x: (N, L, Cin) bf16 -> (N, L, Cout) bf16
    N, L, Cin = x.shape
    Cout = w.shape[2]
    return pl.pallas_call(
        _conv_in_kernel,
        out_shape=jax.ShapeDtypeStruct((N, L, Cout), jnp.bfloat16),
        grid=(N,),
        in_specs=[
            pl.BlockSpec((1, L, Cin), lambda n: (n, 0, 0)),
            pl.BlockSpec((7, Cin, Cout), lambda n: (0, 0, 0)),
            pl.BlockSpec((1, Cout), lambda n: (0, 0)),
        ],
        out_specs=pl.BlockSpec((1, L, Cout), lambda n: (n, 0, 0)),
        scratch_shapes=[pltpu.VMEM((_PAD0 + L, Cin), jnp.bfloat16)],
        compiler_params=_CPARAMS,
    )(x, w, b)


def conv_transpose(x, wc, wp, b2, *, stride, cout):
    # x: (N, Lin, Cin) bf16 -> (N, Lin*stride, cout) bf16
    N, Lin, Cin = x.shape
    SC = stride * cout
    y = pl.pallas_call(
        _convT_kernel,
        out_shape=jax.ShapeDtypeStruct((N, Lin, SC), jnp.bfloat16),
        grid=(N,),
        in_specs=[
            pl.BlockSpec((1, Lin, Cin), lambda n: (n, 0, 0)),
            pl.BlockSpec((Cin, SC), lambda n: (0, 0)),
            pl.BlockSpec((Cin, SC), lambda n: (0, 0)),
            pl.BlockSpec((1, SC), lambda n: (0, 0)),
        ],
        out_specs=pl.BlockSpec((1, Lin, SC), lambda n: (n, 0, 0)),
        scratch_shapes=[pltpu.VMEM((Lin, Cin), jnp.bfloat16)],
        compiler_params=_CPARAMS,
    )(x, wc, wp, b2)
    # (N, Lin, s*Cout) -> (N, Lin*s, Cout): pure row-major metadata reshape.
    return y.reshape(N, Lin * stride, cout)


def res_stack(x, w1, b1, w2, b2, *, final=None):
    # x: (N, L, C) bf16; final = (wf (7,C,1) bf16, bf (1,1) f32) or None
    N, L, C = x.shape
    in_specs = [
        pl.BlockSpec((1, L, C), lambda n: (n, 0, 0)),
        pl.BlockSpec((21, C, C), lambda n: (0, 0, 0)),
        pl.BlockSpec((3, 1, C), lambda n: (0, 0, 0)),
        pl.BlockSpec((3, C, C), lambda n: (0, 0, 0)),
        pl.BlockSpec((3, 1, C), lambda n: (0, 0, 0)),
    ]
    args = [x, w1, b1, w2, b2]
    if final is None:
        kernel = _res_stack_kernel
        out_shape = jax.ShapeDtypeStruct((N, L, C), jnp.bfloat16)
        out_spec = pl.BlockSpec((1, L, C), lambda n: (n, 0, 0))
    else:
        wf, bf = final
        kernel = _res_stack_final_kernel
        in_specs += [
            pl.BlockSpec((7, C, 1), lambda n: (0, 0, 0)),
            pl.BlockSpec((1, 1), lambda n: (0, 0)),
        ]
        args += [wf, bf]
        out_shape = jax.ShapeDtypeStruct((N, L, 1), jnp.float32)
        out_spec = pl.BlockSpec((1, L, 1), lambda n: (n, 0, 0))
    return pl.pallas_call(
        kernel,
        out_shape=out_shape,
        grid=(N,),
        in_specs=in_specs,
        out_specs=out_spec,
        scratch_shapes=[pltpu.VMEM((_PAD + L, C), jnp.bfloat16)],
        compiler_params=_CPARAMS,
    )(*args)


# ----------------------------------------------------------------------------
# Deterministic parameter initialization (mirrors the PyTorch module structure)
# ----------------------------------------------------------------------------
def init_decoder_params(key, C, D, strides=(2, 4, 5, 8)):
    keys = iter(jax.random.split(key, 128))

    def uconv(K, cin, cout, fan_in):
        k1, k2 = jax.random.split(next(keys))
        scale = 1.0 / math.sqrt(fan_in)
        w = jax.random.uniform(k1, (K, cin, cout), jnp.float32, -scale, scale)
        b = jax.random.uniform(k2, (1, cout), jnp.float32, -scale, scale)
        return w, b

    params = {}
    # CausalConv1d(D, 16C, k=7)
    w, b = uconv(7, D, 16 * C, fan_in=7 * D)
    params["conv_in"] = (w.astype(jnp.bfloat16), b)

    stages = []
    chan_in = 16 * C
    out_chs = (8 * C, 4 * C, 2 * C, C)
    strides_used = (strides[3], strides[2], strides[1], strides[0])
    for out_ch, s in zip(out_chs, strides_used):
        # CausalConvTranspose1d(chan_in, out_ch, k=2s, stride=s)
        # (PyTorch ConvTranspose1d fan_in = out_channels * K)
        wT, bT = uconv(2 * s, chan_in, out_ch, fan_in=out_ch * 2 * s)
        # phase-grouped lane-dense weights: wc[i, r*Cout+c] = W[r, i, c]
        wc = jnp.transpose(wT[:s], (1, 0, 2)).reshape(chan_in, s * out_ch)
        wp = jnp.transpose(wT[s:], (1, 0, 2)).reshape(chan_in, s * out_ch)
        bT2 = jnp.tile(bT, (1, s))                                # (1, s*Cout)

        w1s, b1s, w2s, b2s = [], [], [], []
        for _ in _DILATIONS:
            w1, b1 = uconv(7, out_ch, out_ch, fan_in=7 * out_ch)
            w2, b2 = uconv(1, out_ch, out_ch, fan_in=out_ch)
            w1s.append(w1)
            b1s.append(b1)
            w2s.append(w2[0])
            b2s.append(b2)
        stages.append(dict(
            stride=s, cout=out_ch,
            wc=wc.astype(jnp.bfloat16), wp=wp.astype(jnp.bfloat16), bT=bT2,
            w1=jnp.concatenate(w1s, 0).astype(jnp.bfloat16),      # (21, C, C)
            b1=jnp.stack(b1s, 0),                                 # (3, 1, C)
            w2=jnp.stack(w2s, 0).astype(jnp.bfloat16),            # (3, C, C)
            b2=jnp.stack(b2s, 0),                                 # (3, 1, C)
        ))
        chan_in = out_ch
    params["stages"] = stages

    # final CausalConv1d(C, 1, k=7) -- fused into the last res-stack kernel
    wf, bf = uconv(7, C, 1, fan_in=7 * C)
    params["conv_out"] = (wf.astype(jnp.bfloat16), bf)
    return params


def decoder_forward(params, x_nlc):
    # x_nlc: (N, L, D) -> (N, L * prod(strides), 1) float32
    x = x_nlc.astype(jnp.bfloat16)
    w, b = params["conv_in"]
    x = conv_in(x, w, b)
    wf, bf = params["conv_out"]
    stages = params["stages"]
    for i, st in enumerate(stages):
        x = conv_transpose(x, st["wc"], st["wp"], st["bT"],
                           stride=st["stride"], cout=st["cout"])
        final = (wf, bf) if i == len(stages) - 1 else None
        x = res_stack(x, st["w1"], st["b1"], st["w2"], st["b2"], final=final)
    return x


# ----------------------------------------------------------------------------
# Demo
# ----------------------------------------------------------------------------
if __name__ == "__main__":
    key = jax.random.PRNGKey(0)
    C, D = 4, 8            # Decoder(C=4, D=8)
    N, L = 2, 8            # PyTorch input x: (N, D, L) = (2, 8, 8)
    strides = (2, 4, 5, 8)

    pkey, xkey = jax.random.split(key)
    params = init_decoder_params(pkey, C, D, strides)

    x_ncw = jax.random.normal(xkey, (N, D, L), jnp.float32)   # PyTorch NCW
    x_nlc = jnp.transpose(x_ncw, (0, 2, 1))                   # kernel layout NLC

    y_nlc = decoder_forward(params, x_nlc)                    # (N, L*320, 1) f32
    y = jnp.transpose(y_nlc, (0, 2, 1))                       # back to NCW
    jax.block_until_ready(y)

    L_out = L * strides[0] * strides[1] * strides[2] * strides[3]
    assert y.shape == (N, 1, L_out), y.shape
    assert bool(jnp.all(jnp.isfinite(y)))
    print("KERNEL_OK")
</pallas_src>

<mosaic_0001>
module attributes {stable_mosaic.version = 11 : i64} {
  func.func @_conv_in_kernel(%arg0: i32, %arg1: memref<1x8x8xbf16, #tpu.memory_space<vmem>>, %arg2: memref<7x8x64xbf16, #tpu.memory_space<vmem>>, %arg3: memref<1x64xf32, #tpu.memory_space<vmem>>, %arg4: memref<1x8x64xbf16, #tpu.memory_space<vmem>>, %arg5: memref<16x8xbf16, #tpu.memory_space<vmem>>) attributes {dimension_semantics = [#tpu.dimension_semantics<parallel>], iteration_bounds = array<i64: 2>, scalar_prefetch = 0 : i64, scratch_operands = 1 : i64, tpu.core_type = #tpu.core_type<tc>, window_params = [{transform_indices = @transform_0, window_bounds = array<i64: 1, 8, 8>}, {pipeline_mode = #tpu.pipeline_mode<synchronous>, transform_indices = @transform_1, window_bounds = array<i64: 7, 8, 64>}, {pipeline_mode = #tpu.pipeline_mode<synchronous>, transform_indices = @transform_2, window_bounds = array<i64: 1, 64>}, {transform_indices = @transform_3, window_bounds = array<i64: 1, 8, 64>}]} {
    %cst = arith.constant 0.000000e+00 : bf16
    %0 = vector.broadcast %cst : bf16 to vector<8x8xbf16>
    %c0 = arith.constant 0 : index
    %c0_0 = arith.constant 0 : index
    %1 = vector.load %arg5[%c0, %c0_0] : memref<16x8xbf16, #tpu.memory_space<vmem>>, vector<8x8xbf16>
    tpu.vector_store %arg5[%c0, %c0_0], %0 {strides = array<i32>} : memref<16x8xbf16, #tpu.memory_space<vmem>>, vector<8x8xbf16>,
    %c0_1 = arith.constant 0 : index
    %c0_2 = arith.constant 0 : index
    %c0_3 = arith.constant 0 : index
    %2 = vector.load %arg1[%c0_1, %c0_2, %c0_3] : memref<1x8x8xbf16, #tpu.memory_space<vmem>>, vector<1x8x8xbf16>
    %3 = vector.shape_cast %2 : vector<1x8x8xbf16> to vector<8x8xbf16>
    %c8 = arith.constant 8 : index
    %c0_4 = arith.constant 0 : index
    %4 = vector.load %arg5[%c8, %c0_4] : memref<16x8xbf16, #tpu.memory_space<vmem>>, vector<8x8xbf16>
    tpu.vector_store %arg5[%c8, %c0_4], %3 {strides = array<i32>} : memref<16x8xbf16, #tpu.memory_space<vmem>>, vector<8x8xbf16>,
    %cst_5 = arith.constant 0.000000e+00 : f32
    %5 = vector.broadcast %cst_5 : f32 to vector<8x64xf32>
    %c0_6 = arith.constant 0 : index
    %c0_7 = arith.constant 0 : index
    %6 = vector.load %arg3[%c0_6, %c0_7] : memref<1x64xf32, #tpu.memory_space<vmem>>, vector<1x64xf32>
    %7 = vector.broadcast %6 : vector<1x64xf32> to vector<8x64xf32>
    %8 = arith.addf %5, %7 : vector<8x64xf32>
    %c2 = arith.constant 2 : index
    %c0_8 = arith.constant 0 : index
    %9 = vector.load %arg5[%c2, %c0_8] : memref<16x8xbf16, #tpu.memory_space<vmem>>, vector<8x8xbf16>
    %c0_9 = arith.constant 0 : index
    %c0_10 = arith.constant 0 : index
    %c0_11 = arith.constant 0 : index
    %10 = vector.load %arg2[%c0_9, %c0_10, %c0_11] : memref<7x8x64xbf16, #tpu.memory_space<vmem>>, vector<1x8x64xbf16>
    %11 = vector.shape_cast %10 : vector<1x8x64xbf16> to vector<8x64xbf16>
    %cst_12 = arith.constant dense<0.000000e+00> : vector<8x64xf32>
    %12 = tpu.matmul %9, %11, %cst_12 {dimension_numbers = #tpu.dot_dimension_numbers<[1], [0], [0], [1], [0, 0, 1, 1], [], []>} : vector<8x8xbf16>, vector<8x64xbf16>, vector<8x64xf32> -> vector<8x64xf32>
    %13 = arith.addf %8, %12 : vector<8x64xf32>
    %c3 = arith.constant 3 : index
    %c0_13 = arith.constant 0 : index
    %14 = vector.load %arg5[%c3, %c0_13] : memref<16x8xbf16, #tpu.memory_space<vmem>>, vector<8x8xbf16>
    %c1 = arith.constant 1 : index
    %c0_14 = arith.constant 0 : index
    %c0_15 = arith.constant 0 : index
    %15 = vector.load %arg2[%c1, %c0_14, %c0_15] : memref<7x8x64xbf16, #tpu.memory_space<vmem>>, vector<1x8x64xbf16>
    %16 = vector.shape_cast %15 : vector<1x8x64xbf16> to vector<8x64xbf16>
    %cst_16 = arith.constant dense<0.000000e+00> : vector<8x64xf32>
    %17 = tpu.matmul %14, %16, %cst_16 {dimension_numbers = #tpu.dot_dimension_numbers<[1], [0], [0], [1], [0, 0, 1, 1], [], []>} : vector<8x8xbf16>, vector<8x64xbf16>, vector<8x64xf32> -> vector<8x64xf32>
    %18 = arith.addf %13, %17 : vector<8x64xf32>
    %c4 = arith.constant 4 : index
    %c0_17 = arith.constant 0 : index
    %19 = vector.load %arg5[%c4, %c0_17] : memref<16x8xbf16, #tpu.memory_space<vmem>>, vector<8x8xbf16>
    %c2_18 = arith.constant 2 : index
    %c0_19 = arith.constant 0 : index
    %c0_20 = arith.constant 0 : index
    %20 = vector.load %arg2[%c2_18, %c0_19, %c0_20] : memref<7x8x64xbf16, #tpu.memory_space<vmem>>, vector<1x8x64xbf16>
    %21 = vector.shape_cast %20 : vector<1x8x64xbf16> to vector<8x64xbf16>
    %cst_21 = arith.constant dense<0.000000e+00> : vector<8x64xf32>
    %22 = tpu.matmul %19, %21, %cst_21 {dimension_numbers = #tpu.dot_dimension_numbers<[1], [0], [0], [1], [0, 0, 1, 1], [], []>} : vector<8x8xbf16>, vector<8x64xbf16>, vector<8x64xf32> -> vector<8x64xf32>
    %23 = arith.addf %18, %22 : vector<8x64xf32>
    %c5 = arith.constant 5 : index
    %c0_22 = arith.constant 0 : index
    %24 = vector.load %arg5[%c5, %c0_22] : memref<16x8xbf16, #tpu.memory_space<vmem>>, vector<8x8xbf16>
    %c3_23 = arith.constant 3 : index
    %c0_24 = arith.constant 0 : index
    %c0_25 = arith.constant 0 : index
    %25 = vector.load %arg2[%c3_23, %c0_24, %c0_25] : memref<7x8x64xbf16, #tpu.memory_space<vmem>>, vector<1x8x64xbf16>
    %26 = vector.shape_cast %25 : vector<1x8x64xbf16> to vector<8x64xbf16>
    %cst_26 = arith.constant dense<0.000000e+00> : vector<8x64xf32>
    %27 = tpu.matmul %24, %26, %cst_26 {dimension_numbers = #tpu.dot_dimension_numbers<[1], [0], [0], [1], [0, 0, 1, 1], [], []>} : vector<8x8xbf16>, vector<8x64xbf16>, vector<8x64xf32> -> vector<8x64xf32>
    %28 = arith.addf %23, %27 : vector<8x64xf32>
    %c6 = arith.constant 6 : index
    %c0_27 = arith.constant 0 : index
    %29 = vector.load %arg5[%c6, %c0_27] : memref<16x8xbf16, #tpu.memory_space<vmem>>, vector<8x8xbf16>
    %c4_28 = arith.constant 4 : index
    %c0_29 = arith.constant 0 : index
    %c0_30 = arith.constant 0 : index
    %30 = vector.load %arg2[%c4_28, %c0_29, %c0_30] : memref<7x8x64xbf16, #tpu.memory_space<vmem>>, vector<1x8x64xbf16>
    %31 = vector.shape_cast %30 : vector<1x8x64xbf16> to vector<8x64xbf16>
    %cst_31 = arith.constant dense<0.000000e+00> : vector<8x64xf32>
    %32 = tpu.matmul %29, %31, %cst_31 {dimension_numbers = #tpu.dot_dimension_numbers<[1], [0], [0], [1], [0, 0, 1, 1], [], []>} : vector<8x8xbf16>, vector<8x64xbf16>, vector<8x64xf32> -> vector<8x64xf32>
    %33 = arith.addf %28, %32 : vector<8x64xf32>
    %c7 = arith.constant 7 : index
    %c0_32 = arith.constant 0 : index
    %34 = vector.load %arg5[%c7, %c0_32] : memref<16x8xbf16, #tpu.memory_space<vmem>>, vector<8x8xbf16>
    %c5_33 = arith.constant 5 : index
    %c0_34 = arith.constant 0 : index
    %c0_35 = arith.constant 0 : index
    %35 = vector.load %arg2[%c5_33, %c0_34, %c0_35] : memref<7x8x64xbf16, #tpu.memory_space<vmem>>, vector<1x8x64xbf16>
    %36 = vector.shape_cast %35 : vector<1x8x64xbf16> to vector<8x64xbf16>
    %cst_36 = arith.constant dense<0.000000e+00> : vector<8x64xf32>
    %37 = tpu.matmul %34, %36, %cst_36 {dimension_numbers = #tpu.dot_dimension_numbers<[1], [0], [0], [1], [0, 0, 1, 1], [], []>} : vector<8x8xbf16>, vector<8x64xbf16>, vector<8x64xf32> -> vector<8x64xf32>
    %38 = arith.addf %33, %37 : vector<8x64xf32>
    %c8_37 = arith.constant 8 : index
    %c0_38 = arith.constant 0 : index
    %39 = vector.load %arg5[%c8_37, %c0_38] : memref<16x8xbf16, #tpu.memory_space<vmem>>, vector<8x8xbf16>
    %c6_39 = arith.constant 6 : index
    %c0_40 = arith.constant 0 : index
    %c0_41 = arith.constant 0 : index
    %40 = vector.load %arg2[%c6_39, %c0_40, %c0_41] : memref<7x8x64xbf16, #tpu.memory_space<vmem>>, vector<1x8x64xbf16>
    %41 = vector.shape_cast %40 : vector<1x8x64xbf16> to vector<8x64xbf16>
    %cst_42 = arith.constant dense<0.000000e+00> : vector<8x64xf32>
    %42 = tpu.matmul %39, %41, %cst_42 {dimension_numbers = #tpu.dot_dimension_numbers<[1], [0], [0], [1], [0, 0, 1, 1], [], []>} : vector<8x8xbf16>, vector<8x64xbf16>, vector<8x64xf32> -> vector<8x64xf32>
    %43 = arith.addf %38, %42 : vector<8x64xf32>
    %44 = arith.truncf %43 : vector<8x64xf32> to vector<8x64xbf16>
    %c0_43 = arith.constant 0 : index
    %c0_44 = arith.constant 0 : index
    %c0_45 = arith.constant 0 : index
    %45 = vector.load %arg4[%c0_43, %c0_44, %c0_45] : memref<1x8x64xbf16, #tpu.memory_space<vmem>>, vector<1x8x64xbf16>
    %46 = vector.shape_cast %45 : vector<1x8x64xbf16> to vector<8x64xbf16>
    %47 = vector.shape_cast %44 : vector<8x64xbf16> to vector<1x8x64xbf16>
    tpu.vector_store %arg4[%c0_43, %c0_44, %c0_45], %47 {strides = array<i32>} : memref<1x8x64xbf16, #tpu.memory_space<vmem>>, vector<1x8x64xbf16>,
    return
  }
  func.func @transform_0(%arg0: i32) -> (i32, i32, i32) {
    %c0_i32 = arith.constant 0 : i32
    %c0_i32_0 = arith.constant 0 : i32
    %c0_i32_1 = arith.constant 0 : i32
    return %arg0, %c0_i32, %c0_i32_0 : i32, i32, i32
  }
  func.func @transform_1(%arg0: i32) -> (i32, i32, i32) {
    %c0_i32 = arith.constant 0 : i32
    %c0_i32_0 = arith.constant 0 : i32
    %c0_i32_1 = arith.constant 0 : i32
    %c0_i32_2 = arith.constant 0 : i32
    return %c0_i32, %c0_i32_0, %c0_i32_1 : i32, i32, i32
  }
  func.func @transform_2(%arg0: i32) -> (i32, i32) {
    %c0_i32 = arith.constant 0 : i32
    %c0_i32_0 = arith.constant 0 : i32
    %c0_i32_1 = arith.constant 0 : i32
    return %c0_i32, %c0_i32_0 : i32, i32
  }
  func.func @transform_3(%arg0: i32) -> (i32, i32, i32) {
    %c0_i32 = arith.constant 0 : i32
    %c0_i32_0 = arith.constant 0 : i32
    %c0_i32_1 = arith.constant 0 : i32
    return %arg0, %c0_i32, %c0_i32_0 : i32, i32, i32
  }
}

</mosaic_0001>

<bundles_post_ra>
// kernel: tpu_custom_call.1
= control target key start
LH: loop header
LB: loop body
LE: loop exit
PB: predicated region body
PF: predicated region fallthrough
CT: control target
= control target key end

     0   :  { %8 = vsyncpa [#allocation4], 0  ;;  %s918_s0 = inlined_call_operand.hbm [shape: bf16[2,8,8], index: 0, kind: input, shape index: {}]   ;;  %s919_s1 = inlined_call_operand.hbm [shape: bf16[7,8,64], index: 1, kind: input, shape index: {}]   ;;  %s920_s2 = inlined_call_operand.vmem [shape: f32[1,64], index: 2, kind: input, shape index: {}]   ;;  %s921_s3 = inlined_call_operand.hbm [shape: bf16[2,8,64], index: 3, kind: output, shape index: {}]  }
   0x1   :  { %10 = vsyncpa [#allocation4 + $0x1], 0 }
   0x2   :  { %11 = vsyncpa [#allocation7], 0 }
   0x3   :  { %12 = vsyncpa [#allocation5], 0 }
   0x4   :  { %14 = vsyncpa [#allocation5 + $0x1], 0  ;;  %s761_s12 = smov 0   ;;  %s763_s13 = smov 0  }
   0x5   :  { %s765_s14 = smov 0   ;;  %s767_s15 = smov 0  }
   0x6 LB: > { %s130_s18 = sshll.u32 %s919_s1, 4  ;;  %s785_s19 = sadd.s32 4294967295, %s735_s15   ;;  %s735_s15 = sphi %s767_s15, %s931_s15   ;;  %s731_s14 = sphi %s765_s14, %s930_s14   ;;  %s727_s13 = sphi %s763_s13, %s929_s13   ;;  %s723_s12 = sphi %s761_s12, %s928_s12   ;;  %s131_s18 = int_to_ptr.hbm [resolvable:$true] %s130_s18 }
   0x7   : > { %p524_p0 = scmp.ge.s32.totalorder %s735_s15, 1  ;;  %p41_p1 = scmp.eq.s32.totalorder %s785_s19, 0 }
   0x8   : > { %p119_p2 = scmp.lt.s32.totalorder %s735_s15, 3  ;;  %s737_s21 = smov [#allocation6]  }
   0x9   : > { %s132_s22 = sshll.u32 %s737_s21, 4  ;;  %s738_s23 = smov 64   ;;  %s133_s22 = int_to_ptr.vmem [resolvable:$true] %s132_s22 }
   0xa   : > { %p790_p3 = pnand %p524_p0, %p119_p2  ;;  %s739_s24 = smov 4  }
   0xb   : > { %s523_s25 = sadd.s32 4294967294, %s735_s15   ;;  %s801_s26 = sadd.s32 1, %s735_s15  }
   0xc   : > { %p552_p4 = pneg %p790_p3  ;;  %s27_s27 = sadd.s32 1, %s731_s14 }
   0xd   : > { %s24_s28 = ssub.s32 %s735_s15, %s801_s26  ;;  %p34_p7 = scmp.ne.s32.totalorder %s731_s14, %s727_s13 }
   0xe   : > { %p553_p6 = pnand %p552_p4, %p41_p1  ;;  %p25_p8 = scmp.eq.s32.totalorder %s24_s28, 0 }
   0xf   : > { %p35_p9 = scmp.eq.s32.totalorder %s735_s15, 0  ;;  %p40_p10 = scmp.ne.s32.totalorder %s727_s13, %s723_s12 }
  0x10   : > { %555 = dma.hbm_to_vmem [thread:$0]  (!%p553_p6), %s131_s18, 448, %s133_s22, [#allocation7], %s738_s23, %s738_s23, %s739_s24  }
  0x11   : > { %p106_p11 = scmp.eq.s32.totalorder %s785_s19, 1  ;;  %p817_p12 = por %p41_p1, %p40_p10 }
  0x12   : > { %s813_s29 = scalar_select %p25_p8, %s731_s14, %s27_s27  }
  0x13   : > { %p821_p13 = por %p106_p11, %p34_p7  ;;  %p112_p0 = scmp.eq.s32.totalorder %s523_s25, 1 }
  0x14   : > { %p36_p2 = por %p35_p9, %p34_p7  ;;  %s149_s5 = sand.u32 1, %s731_s14  }
  0x15   : > { %p826_p4 = por %p112_p0, %p40_p10  ;;  %p565_p6 = scmp.lt.s32.totalorder %s735_s15, 2 }
  0x16   : > { %s527_s7 = sshll.u32 %s149_s5, 2  ;;  %s528_s8 = sshll.u32 %s735_s15, 2 }
  0x17   : > { %s157_s11 = scalar_lea.hbm %s918_s0, %s528_s8  ;;  %s153_s17 = scalar_lea.vmem [#allocation3], %s527_s7 }
  0x18   : > { %s159_s16 = sshll.u32 %s157_s11, 4  ;;  %s161_s18 = sshll.u32 %s153_s17, 4  ;;  %s160_s16 = int_to_ptr.hbm [resolvable:$true] %s159_s16  ;;  %s162_s18 = int_to_ptr.vmem [resolvable:$true] %s161_s18 }
  0x19   : > { %p835_p8 = pnand %p565_p6, %p36_p2  ;;  %s150_s22 = scalar_lea.sflag [#allocation4], %s149_s5 }
  0x1a   : > { %s635_s23 = sshra.s32 %s160_s16, 4  ;;  %s642_s28 = scalar_lea.hbm %s918_s0, 8  ;;  %s636_s23 = int_to_ptr.hbm [resolvable:$true] %s635_s23 }
  0x1b   : > { %s637_s24 = scalar_lea.hbm %s636_s23, 4  ;;  %p639_p9 = pneg %p835_p8 }
  0x1c   : > { %p638_p7 = scmp.ne.s32.totalorder %s636_s23, %s637_s24  ;;  %p643_p0 = scmp.lt.s32.totalorder %s636_s23, %s918_s0 }
  0x1d   : > { %p644_p2 = scmp.lt.s32.totalorder %s642_s28, %s637_s24 }
  0x1e   : > { %p640_p10 = pnand %p639_p9, %p638_p7 }
  0x1f   : > { %p645_p6 = por %p644_p2, %p643_p0 }
  0x20   : > { %p641_p11 = pneg %p640_p10 }
  0x22   : > { %p646_p5 = pnand %p645_p6, %p641_p11 }
  0x24   : > { %649 = shalt.err (!%p646_p5)
}
  0x25   : > { %559 = dma.hbm_to_vmem [thread:$0]  (!%p835_p8), %s160_s16, 64, %s162_s18, %s150_s22  }
  0x26   : > { %170 = sbr.rel (%p790_p3) target bundleno = 220 (0xdc), region = 32  ;;  %s852_s5 = sand.u32 (!%p790_p3), 1, %s727_s13  }
  0x27   : > { %s530_s9 = sshll.u32 (!%p790_p3), %s852_s5, 2  ;;  %s173_s10 = scalar_lea.sflag (!%p790_p3), [#allocation4], %s852_s5 }
  0x28   : > { %s176_s11 = scalar_lea.vmem (!%p790_p3), [#allocation3], %s530_s9 }
  0x2b   : > { %710 = dma.done.wait (%p817_p12), %s173_s10, 64  }
  0x2c   : > { %712 = vsyncadd (%p817_p12), %s173_s10, 4294967232 }
  0x2d   : > { %714 = dma.done.wait (%p41_p1), [#allocation7], 448  }
  0x2e   : > { %716 = vsyncadd (%p41_p1), [#allocation7], 4294966848  ;;  %vm206_vm0 = vcmask 60416   ;;  %v740_v0 = vmov 0   ;;  %vm228_vm1 = vcmask 1043456   ;;  %vm224_vm2 = vcmask 64512  }
  0x2f   : > { %207 = vst.msk [vmem:[#allocation2] sm:$0xf] %vm206_vm0, %v740_v0  ;;  %v217_v1 = vld [vmem:[#allocation6] sm:$0xf]  ;;  %v282_v2 = vld [vmem:[#allocation6 + $0x8] sm:$0xf] }
  0x30   : > { %v208_v3 = vld [vmem:[%s176_s11] sm:$0xf]  ;;  %v230_v4 = vsel %vm228_vm1, %v217_v1, 0  ;;  %v291_v5 = vsel %vm228_vm1, %v282_v2, 0  ;;  %v248_v8 = vld [vmem:[#allocation6 + $0x4] sm:$0xf] }
  0x31   : > { %209 = vst.msk [vmem:[#allocation2 + $0x4] sm:$0xf] %vm206_vm0, %v208_v3  ;;  %239 = vmatpush.bf16.msra.mxu0 %v230_v4  ;;  %300 = vmatpush.bf16.msra.mxu2 %v291_v5  ;;  %v403_v7 = vld [vmem:[#allocation6 + $0x18] sm:$0xf]  ;;  %v264_v10 = vsel %vm228_vm1, %v248_v8, 0  ;;  %s541_s16 = sshll.u32 %s785_s19, 2 }
  0x32   : > { %v408_v9 = vsel %vm228_vm1, %v403_v7, 0  ;;  %v309_v11 = vld [vmem:[#allocation6 + $0xc] sm:$0xf]  ;;  %v343_v12 = vld [vmem:[#allocation6 + $0x10] sm:$0xf]  ;;  %273 = vmatpush.bf16.msra.mxu1 %v264_v10  ;;  %s438_s21 = scalar_lea.hbm %s921_s3, %s541_s16  ;;  %s204_s22 = scalar_lea.vmem [#allocation8], %s530_s9 }
  0x33   : > { %v325_v14 = vsel %vm228_vm1, %v309_v11, 0  ;;  %v352_v15 = vsel %vm228_vm1, %v343_v12, 0  ;;  %v370_v16 = vld [vmem:[#allocation6 + $0x14] sm:$0xf]  ;;  %v604_v55 = vld [vmem:[%s920_s2] ss:$0 sm:$0xff] }
  0x34   : > { %334 = vmatpush.bf16.msra.mxu3 %v325_v14  ;;  %v386_v17 = vsel %vm228_vm1, %v370_v16, 0  ;;  %s440_s23 = sshll.u32 %s204_s22, 4  ;;  %s442_s24 = sshll.u32 %s438_s21, 4  ;;  %vm425_vm3 = vcmask 519168   ;;  %s441_s23 = int_to_ptr.vmem [resolvable:$true] %s440_s23  ;;  %s443_s24 = int_to_ptr.hbm [resolvable:$true] %s442_s24 }
  0x35   : > { %417 = vmatpush.bf16.msrb.mxu2 %v408_v9  ;;  %361 = vmatpush.bf16.msrb.mxu0 %v352_v15  ;;  %s428_s19 = scalar_lea.sflag [#allocation5], %s852_s5  ;;  %s679_s25 = sshra.s32 %s443_s24, 4  ;;  %s680_s25 = int_to_ptr.hbm [resolvable:$true] %s679_s25 }
  0x36   : > { %v215_v6 = vld [vmem:[#allocation2] sm:$0xe]  ;;  %395 = vmatpush.bf16.msrb.mxu1 %v386_v17  ;;  %s681_s27 = scalar_lea.hbm %s680_s25, 4  ;;  %s685_s8 = scalar_lea.hbm %s921_s3, 8 }
  0x37   : > { %v280_v13 = vld [vmem:[#allocation2] sm:$0xc]  ;;  %v220_v18 = vunpack.c.l.b16 %v215_v6  ;;  %p682_p1 = scmp.ne.s32.totalorder %s680_s25, %s681_s27  ;;  %p686_p12 = scmp.lt.s32.totalorder %s680_s25, %s921_s3 }
  0x38   : > { %v284_v19 = vunpack.c.l.b16 %v280_v13  ;;  %v216_v20 = vld [vmem:[#allocation2 + $0x4] sm:$0x1]  ;;  %v341_v30 = vld [vmem:[#allocation2] sm:$0x8]  ;;  %p687_p8 = scmp.lt.s32.totalorder %s685_s8, %s681_s27 }
  0x39   : > { %v246_v21 = vld [vmem:[#allocation2 + $0x4] sm:$0x3]  ;;  %v221_v23 = vunpack.c.l.b16 %v216_v20  ;;  %v345_v40 = vunpack.c.l.b16 %v341_v30  ;;  %p683_p3 = pnand %p682_p1, %p821_p13 }
  0x3a   : > { %v307_v22 = vld [vmem:[#allocation2 + $0x4] sm:$0x7]  ;;  %v250_v24 = vunpack.c.l.b16 %v246_v21  ;;  %p688_p7 = por %p687_p8, %p686_p12 }
  0x3b   : > { %v311_v25 = vunpack.c.l.b16 %v307_v22  ;;  %v222_v26 = vpack.c.b16 %v221_v23, %v220_v18  ;;  %v368_v31 = vld [vmem:[#allocation2 + $0x4] sm:$0xf]  ;;  %p684_p5 = pneg %p683_p3 }
  0x3c   : > { %v285_v27 = vpack.c.b16 %v250_v24, %v284_v19  ;;  %v251_v28 = vpack.c.b16 %v250_v24, %v220_v18  ;;  %v372_v41 = vunpack.c.l.b16 %v368_v31 }
  0x3d   : > { %v312_v29 = vpack.c.b16 %v311_v25, %v284_v19  ;;  %v223_v32 = vrot.slane %v222_v26, 1  ;;  %v346_v47 = vpack.c.b16 %v311_v25, %v345_v40  ;;  %p689_p9 = pnand %p688_p7, %p684_p5 }
  0x3e   : > { %v286_v33 = vrot.slane %v285_v27, 2  ;;  %v253_v34 = vshrl.u32 %v251_v28, 16  ;;  %v256_v35 = vshll.u32 %v251_v28, 16  ;;  %v373_v46 = vpack.c.b16 %v372_v41, %v345_v40 }
  0x3f   : > { %v314_v36 = vshrl.u32 %v312_v29, 16  ;;  %v317_v37 = vshll.u32 %v312_v29, 16  ;;  %533 = vmatmul.msk.bf16.vlgmr.msra.gmra.mxu0 %vm224_vm2, %v223_v32  ;;  %v347_v50 = vrot.slane %v346_v47, 3 }
  0x40   : > { %535 = vmatmul.msk.bf16.vlgmr.msra.gmra.mxu2 %vm224_vm2, %v286_v33  ;;  %v255_v38 = vrot.slane %v253_v34, 1  ;;  %v258_v39 = vrot.slane %v256_v35, 2  ;;  %v375_v48 = vshrl.u32 %v373_v46, 16  ;;  %v378_v49 = vshll.u32 %v373_v46, 16 }
  0x41   : > { %v316_v42 = vrot.slane %v314_v36, 2  ;;  %v319_v43 = vrot.slane %v317_v37, 3 }
  0x42   : > { %v259_v44 = vor.u32 %v258_v39, %v255_v38  ;;  %v377_v51 = vrot.slane %v375_v48, 3  ;;  %v380_v52 = vrot.slane %v378_v49, 4 }
  0x43   : > { %v320_v45 = vor.u32 %v319_v43, %v316_v42 }
  0x44   : > { %534 = vmatmul.msk.bf16.vlgmr.msra.gmra.mxu1 %vm224_vm2, %v259_v44  ;;  %v381_v53 = vor.u32 %v380_v52, %v377_v51 }
  0x45   : > { %536 = vmatmul.msk.bf16.vlgmr.msra.gmra.mxu3 %vm224_vm2, %v320_v45 }
  0x4f   : > { %537 = vmatmul.msk.bf16.vlgmr.msrb.gmra.mxu0 %vm224_vm2, %v347_v50 }
  0x50   : > { %539 = vmatmul.msk.bf16.vlgmr.msrb.gmra.mxu2 %vm224_vm2, %v368_v31 }
  0x54   : > { %538 = vmatmul.msk.bf16.vlgmr.msrb.gmra.mxu1 %vm224_vm2, %v381_v53 }
  0xbc   : > { %v241_v54 = vpop.f32.mrf.mxu0 }
  0xbd   : > { %v245_v58 = vadd.f32 %v604_v55, %v241_v54 }
  0xc1   : > { %v275_v56 = vpop.f32.mrf.mxu1 }
  0xc2   : > { %v279_v60 = vadd.f32 %v275_v56, %v245_v58 }
  0xc3   : > { %v302_v57 = vpop.f32.mrf.mxu2 }
  0xc4   : > { %v243_v59 = vpop.f32.mrf.mxu0  ;;  %v306_v0 = vadd.f32 %v302_v57, %v279_v60 }
  0xc8   : > { %v336_v61 = vpop.f32.mrf.mxu3 }
  0xc9   : > { %v277_v62 = vpop.f32.mrf.mxu1  ;;  %v340_v2 = vadd.f32 %v336_v61, %v306_v0 }
  0xcb   : > { %v304_v63 = vpop.f32.mrf.mxu2 }
  0xcc   : > { %v363_v1 = vpop.f32.mrf.mxu0 }
  0xcd   : > { %v367_v3 = vadd.f32 %v363_v1, %v340_v2 }
  0xd0   : > { %v338_v4 = vpop.f32.mrf.mxu3 }
  0xd1   : > { %v397_v5 = vpop.f32.mrf.mxu1 }
  0xd2   : > { %v401_v6 = vadd.f32 %v397_v5, %v367_v3 }
  0xd3   : > { %v419_v7 = vpop.f32.mrf.mxu2 }
  0xd4   : > { %v423_v8 = vadd.f32 %v419_v7, %v401_v6  ;;  %v365_v9 = vpop.f32.mrf.mxu0 }
  0xd6   : > { %v424_v10 = vpack.c.bf16 %v423_v8, %v423_v8 }
  0xd8   : > { %426 = vst.msk [vmem:[%s204_s22] sm:$0xf] %vm425_vm3, %v424_v10 }
  0xd9   : > { %v399_v11 = vpop.f32.mrf.mxu1 }
  0xda   : > { %692 = shalt.err (!%p689_p9)
}
  0xdb   : > { %550 = dma.vmem_to_hbm [thread:$0]  (%p821_p13), %s441_s23, 64, %s443_s24, %s428_s19   ;;  %v421_v12 = vpop.f32.mrf.mxu2 }
  0xdc PF: > { %s454_s5 = sand.u32 1, %s723_s12   ;;  %p927_p10 = scmp.ge.s32.totalorder %s735_s15, 2 }
  0xdd   : > { %s455_s11 = scalar_lea.sflag [#allocation5], %s454_s5 }
  0xde   : > { %p561_p11 = pnand %p927_p10, %p826_p4 }
  0xe0   : > { %p562_p0 = pneg %p561_p11 }
  0xe2   : > { %718 = dma.done.wait (%p562_p0), %s455_s11, 64  }
  0xe3   : > { %720 = vsyncadd (%p562_p0), %s455_s11, 4294967232  ;;  %p17_p2 = scmp.ge.s32.totalorder %s801_s26, 4   ;;  %s928_s12 = smov %s727_s13 }
  0xe4   : > { %s929_s13 = smov %s731_s14  ;;  %s930_s14 = smov %s813_s29 }
  0xe5   : > { %s931_s15 = smov %s801_s26  ;;  %19 = sbr.rel (!%p17_p2) target bundleno = 6 (0x6), region = 87 }
  0xea   :  { %461 = vsyncpa [#allocation4], 1 }
  0xeb   :  { %463 = vsyncpa [#allocation4 + $0x1], 1 }
  0xec   :  { %464 = vsyncpa [#allocation7], 1 }
  0xed   :  { %465 = vsyncpa [#allocation5], 1 }
  0xee   :  { %467 = vsyncpa [#allocation5 + $0x1], 1 }

</bundles_post_ra>
